<compile_context>
chip_gen: v7x
topology: tpu7x:2x2x1
jax: 0.10.0
libtpu: 0.0.40
codegen_flags: <defaults>
</compile_context>

<pallas_src>
import jax
import jax.numpy as jnp
from jax.experimental import pallas as pl
from jax.experimental.pallas import tpu as pltpu


def _bag_mlp_kernel(x_ref,
                    w1_ref, b1_ref,
                    w2_ref, b2_ref,
                    w3_ref, b3_ref,
                    w4_ref, b4_ref,
                    w5_ref, b5_ref,
                    wf_ref, bf_ref,
                    o_ref):
    """One batch tile of the whole MLP. x_ref: [D, TILE_N]; o_ref: [1, TILE_N]."""
    f32 = jnp.float32
    x = x_ref[...]                                                    # [D, TILE_N]

    # dense_input -> tanh        (dropout p=0.2 is identity at inference)
    h = jnp.tanh(jnp.dot(w1_ref[...], x, preferred_element_type=f32) + b1_ref[...])
    # dense_intermediate_1..3 -> relu
    h = jnp.maximum(jnp.dot(w2_ref[...], h, preferred_element_type=f32) + b2_ref[...], 0.0)
    h = jnp.maximum(jnp.dot(w3_ref[...], h, preferred_element_type=f32) + b3_ref[...], 0.0)
    h = jnp.maximum(jnp.dot(w4_ref[...], h, preferred_element_type=f32) + b4_ref[...], 0.0)
    # dense_intermediate_4 -> tanh
    h = jnp.tanh(jnp.dot(w5_ref[...], h, preferred_element_type=f32) + b5_ref[...])

    # dense_intermediate_final (H -> 1): broadcast-mul + sublane reduce, lane-dense result.
    o_ref[...] = (jnp.sum(wf_ref[...] * h, axis=0, keepdims=True)
                  + bf_ref[...]).astype(o_ref.dtype)


def bag_of_neural_net_forward(x, params, *, tile_n=512):
    """x: [N, D] float32.  params: list of (W, b) with W:[in,out], b:[1,out] (PyTorch layout)."""
    N, D = x.shape
    (w1, b1), (w2, b2), (w3, b3), (w4, b4), (w5, b5), (wf, bf) = params

    # Transpose once to the kernel layout: W -> [out, in]; biases -> [out, 1].
    # The final layer stays [H, 1] so it can broadcast against h [H, TILE_N].
    flat = [
        w1.T, b1.reshape(-1, 1),
        w2.T, b2.reshape(-1, 1),
        w3.T, b3.reshape(-1, 1),
        w4.T, b4.reshape(-1, 1),
        w5.T, b5.reshape(-1, 1),
        wf,   bf.reshape(1, 1),
    ]

    # Batch goes on the lane axis; pad N up to a multiple of tile_n (tile_n % 128 == 0).
    tile_n = max(128, min(int(tile_n), pl.cdiv(N, 128) * 128))
    n_pad = pl.cdiv(N, tile_n) * tile_n
    x_t = jnp.pad(x.T, ((0, 0), (0, n_pad - N)))                      # [D, n_pad]

    grid = (n_pad // tile_n,)
    const = lambda i: (0, 0)                                          # weights resident in VMEM

    in_specs = [pl.BlockSpec((D, tile_n), lambda i: (0, i))]
    for arr in flat:
        in_specs.append(pl.BlockSpec(arr.shape, const))

    out = pl.pallas_call(
        _bag_mlp_kernel,
        out_shape=jax.ShapeDtypeStruct((1, n_pad), jnp.float32),
        grid=grid,
        in_specs=in_specs,
        out_specs=pl.BlockSpec((1, tile_n), lambda i: (0, i)),
        compiler_params=pltpu.CompilerParams(
            dimension_semantics=("parallel",),
        ),
    )(x_t, *flat)

    return out[0, :N].reshape(N, 1)


def _init_linear(key, fan_in, fan_out):
    """Deterministic PyTorch-style nn.Linear init (U[-1/sqrt(fan_in), 1/sqrt(fan_in)])."""
    kw, kb = jax.random.split(key)
    bound = 1.0 / (fan_in ** 0.5)
    W = jax.random.uniform(kw, (fan_in, fan_out), minval=-bound, maxval=bound,
                           dtype=jnp.float32)
    b = jax.random.uniform(kb, (1, fan_out), minval=-bound, maxval=bound,
                           dtype=jnp.float32)
    return W, b


def make_params(key, input_size, rank_of_kernel):
    hidden = max(rank_of_kernel, 32)
    keys = jax.random.split(key, 6)
    return [
        _init_linear(keys[0], input_size, hidden),   # dense_input
        _init_linear(keys[1], hidden, hidden),       # dense_intermediate_1
        _init_linear(keys[2], hidden, hidden),       # dense_intermediate_2
        _init_linear(keys[3], hidden, hidden),       # dense_intermediate_3
        _init_linear(keys[4], hidden, hidden),       # dense_intermediate_4
        _init_linear(keys[5], hidden, 1),            # dense_intermediate_final
    ]


def reference_forward(x, params):
    (w1, b1), (w2, b2), (w3, b3), (w4, b4), (w5, b5), (wf, bf) = params
    h = jnp.tanh(x @ w1 + b1)
    h = jnp.maximum(h @ w2 + b2, 0.0)
    h = jnp.maximum(h @ w3 + b3, 0.0)
    h = jnp.maximum(h @ w4 + b4, 0.0)
    h = jnp.tanh(h @ w5 + b5)
    return h @ wf + bf


if __name__ == "__main__":
    key = jax.random.PRNGKey(0)
    k_params, k_x = jax.random.split(key)

    input_size = 16
    rank_of_kernel = 8          # -> hidden = max(8, 32) = 32
    batch = 8                   # small; exercises batch padding to the 128-wide tile

    params = make_params(k_params, input_size, rank_of_kernel)
    x = jax.random.normal(k_x, (batch, input_size), dtype=jnp.float32)

    out = bag_of_neural_net_forward(x, params)
    out = jax.block_until_ready(out)

    ref = reference_forward(x, params)
    assert out.shape == (batch, 1)
    assert jnp.allclose(out, ref, atol=1e-5, rtol=1e-5)

    print("KERNEL_OK")
</pallas_src>

<mosaic_0001>
module attributes {stable_mosaic.version = 11 : i64} {
  func.func @_bag_mlp_kernel(%arg0: i32, %arg1: memref<16x128xf32, #tpu.memory_space<vmem>>, %arg2: memref<32x16xf32, #tpu.memory_space<vmem>>, %arg3: memref<32x1xf32, #tpu.memory_space<vmem>>, %arg4: memref<32x32xf32, #tpu.memory_space<vmem>>, %arg5: memref<32x1xf32, #tpu.memory_space<vmem>>, %arg6: memref<32x32xf32, #tpu.memory_space<vmem>>, %arg7: memref<32x1xf32, #tpu.memory_space<vmem>>, %arg8: memref<32x32xf32, #tpu.memory_space<vmem>>, %arg9: memref<32x1xf32, #tpu.memory_space<vmem>>, %arg10: memref<32x32xf32, #tpu.memory_space<vmem>>, %arg11: memref<32x1xf32, #tpu.memory_space<vmem>>, %arg12: memref<32x1xf32, #tpu.memory_space<vmem>>, %arg13: memref<1x1xf32, #tpu.memory_space<vmem>>, %arg14: memref<1x128xf32, #tpu.memory_space<vmem>>) attributes {dimension_semantics = [#tpu.dimension_semantics<parallel>], iteration_bounds = array<i64: 1>, scalar_prefetch = 0 : i64, scratch_operands = 0 : i64, tpu.core_type = #tpu.core_type<tc>, window_params = [{transform_indices = @transform_0, window_bounds = array<i64: 16, 128>}, {pipeline_mode = #tpu.pipeline_mode<synchronous>, transform_indices = @transform_1, window_bounds = array<i64: 32, 16>}, {pipeline_mode = #tpu.pipeline_mode<synchronous>, transform_indices = @transform_2, window_bounds = array<i64: 32, 1>}, {pipeline_mode = #tpu.pipeline_mode<synchronous>, transform_indices = @transform_3, window_bounds = array<i64: 32, 32>}, {pipeline_mode = #tpu.pipeline_mode<synchronous>, transform_indices = @transform_4, window_bounds = array<i64: 32, 1>}, {pipeline_mode = #tpu.pipeline_mode<synchronous>, transform_indices = @transform_5, window_bounds = array<i64: 32, 32>}, {pipeline_mode = #tpu.pipeline_mode<synchronous>, transform_indices = @transform_6, window_bounds = array<i64: 32, 1>}, {pipeline_mode = #tpu.pipeline_mode<synchronous>, transform_indices = @transform_7, window_bounds = array<i64: 32, 32>}, {pipeline_mode = #tpu.pipeline_mode<synchronous>, transform_indices = @transform_8, window_bounds = array<i64: 32, 1>}, {pipeline_mode = #tpu.pipeline_mode<synchronous>, transform_indices = @transform_9, window_bounds = array<i64: 32, 32>}, {pipeline_mode = #tpu.pipeline_mode<synchronous>, transform_indices = @transform_10, window_bounds = array<i64: 32, 1>}, {pipeline_mode = #tpu.pipeline_mode<synchronous>, transform_indices = @transform_11, window_bounds = array<i64: 32, 1>}, {pipeline_mode = #tpu.pipeline_mode<synchronous>, transform_indices = @transform_12, window_bounds = array<i64: 1, 1>}, {transform_indices = @transform_13, window_bounds = array<i64: 1, 128>}]} {
    %c0 = arith.constant 0 : index
    %c0_0 = arith.constant 0 : index
    %0 = vector.load %arg1[%c0, %c0_0] : memref<16x128xf32, #tpu.memory_space<vmem>>, vector<16x128xf32>
    %c0_1 = arith.constant 0 : index
    %c0_2 = arith.constant 0 : index
    %1 = vector.load %arg2[%c0_1, %c0_2] : memref<32x16xf32, #tpu.memory_space<vmem>>, vector<32x16xf32>
    %cst = arith.constant dense<0.000000e+00> : vector<32x128xf32>
    %2 = tpu.matmul %1, %0, %cst {dimension_numbers = #tpu.dot_dimension_numbers<[1], [0], [0], [1], [0, 0, 1, 1], [], []>} : vector<32x16xf32>, vector<16x128xf32>, vector<32x128xf32> -> vector<32x128xf32>
    %c0_3 = arith.constant 0 : index
    %c0_4 = arith.constant 0 : index
    %3 = vector.load %arg3[%c0_3, %c0_4] : memref<32x1xf32, #tpu.memory_space<vmem>>, vector<32x1xf32>
    %4 = vector.broadcast %3 : vector<32x1xf32> to vector<32x128xf32>
    %5 = arith.addf %2, %4 : vector<32x128xf32>
    %6 = math.tanh %5 : vector<32x128xf32>
    %c0_5 = arith.constant 0 : index
    %c0_6 = arith.constant 0 : index
    %7 = vector.load %arg4[%c0_5, %c0_6] : memref<32x32xf32, #tpu.memory_space<vmem>>, vector<32x32xf32>
    %cst_7 = arith.constant dense<0.000000e+00> : vector<32x128xf32>
    %8 = tpu.matmul %7, %6, %cst_7 {dimension_numbers = #tpu.dot_dimension_numbers<[1], [0], [0], [1], [0, 0, 1, 1], [], []>} : vector<32x32xf32>, vector<32x128xf32>, vector<32x128xf32> -> vector<32x128xf32>
    %c0_8 = arith.constant 0 : index
    %c0_9 = arith.constant 0 : index
    %9 = vector.load %arg5[%c0_8, %c0_9] : memref<32x1xf32, #tpu.memory_space<vmem>>, vector<32x1xf32>
    %10 = vector.broadcast %9 : vector<32x1xf32> to vector<32x128xf32>
    %11 = arith.addf %8, %10 : vector<32x128xf32>
    %cst_10 = arith.constant 0.000000e+00 : f32
    %12 = vector.broadcast %cst_10 : f32 to vector<32x128xf32>
    %13 = arith.maximumf %11, %12 : vector<32x128xf32>
    %c0_11 = arith.constant 0 : index
    %c0_12 = arith.constant 0 : index
    %14 = vector.load %arg6[%c0_11, %c0_12] : memref<32x32xf32, #tpu.memory_space<vmem>>, vector<32x32xf32>
    %cst_13 = arith.constant dense<0.000000e+00> : vector<32x128xf32>
    %15 = tpu.matmul %14, %13, %cst_13 {dimension_numbers = #tpu.dot_dimension_numbers<[1], [0], [0], [1], [0, 0, 1, 1], [], []>} : vector<32x32xf32>, vector<32x128xf32>, vector<32x128xf32> -> vector<32x128xf32>
    %c0_14 = arith.constant 0 : index
    %c0_15 = arith.constant 0 : index
    %16 = vector.load %arg7[%c0_14, %c0_15] : memref<32x1xf32, #tpu.memory_space<vmem>>, vector<32x1xf32>
    %17 = vector.broadcast %16 : vector<32x1xf32> to vector<32x128xf32>
    %18 = arith.addf %15, %17 : vector<32x128xf32>
    %cst_16 = arith.constant 0.000000e+00 : f32
    %19 = vector.broadcast %cst_16 : f32 to vector<32x128xf32>
    %20 = arith.maximumf %18, %19 : vector<32x128xf32>
    %c0_17 = arith.constant 0 : index
    %c0_18 = arith.constant 0 : index
    %21 = vector.load %arg8[%c0_17, %c0_18] : memref<32x32xf32, #tpu.memory_space<vmem>>, vector<32x32xf32>
    %cst_19 = arith.constant dense<0.000000e+00> : vector<32x128xf32>
    %22 = tpu.matmul %21, %20, %cst_19 {dimension_numbers = #tpu.dot_dimension_numbers<[1], [0], [0], [1], [0, 0, 1, 1], [], []>} : vector<32x32xf32>, vector<32x128xf32>, vector<32x128xf32> -> vector<32x128xf32>
    %c0_20 = arith.constant 0 : index
    %c0_21 = arith.constant 0 : index
    %23 = vector.load %arg9[%c0_20, %c0_21] : memref<32x1xf32, #tpu.memory_space<vmem>>, vector<32x1xf32>
    %24 = vector.broadcast %23 : vector<32x1xf32> to vector<32x128xf32>
    %25 = arith.addf %22, %24 : vector<32x128xf32>
    %cst_22 = arith.constant 0.000000e+00 : f32
    %26 = vector.broadcast %cst_22 : f32 to vector<32x128xf32>
    %27 = arith.maximumf %25, %26 : vector<32x128xf32>
    %c0_23 = arith.constant 0 : index
    %c0_24 = arith.constant 0 : index
    %28 = vector.load %arg10[%c0_23, %c0_24] : memref<32x32xf32, #tpu.memory_space<vmem>>, vector<32x32xf32>
    %cst_25 = arith.constant dense<0.000000e+00> : vector<32x128xf32>
    %29 = tpu.matmul %28, %27, %cst_25 {dimension_numbers = #tpu.dot_dimension_numbers<[1], [0], [0], [1], [0, 0, 1, 1], [], []>} : vector<32x32xf32>, vector<32x128xf32>, vector<32x128xf32> -> vector<32x128xf32>
    %c0_26 = arith.constant 0 : index
    %c0_27 = arith.constant 0 : index
    %30 = vector.load %arg11[%c0_26, %c0_27] : memref<32x1xf32, #tpu.memory_space<vmem>>, vector<32x1xf32>
    %31 = vector.broadcast %30 : vector<32x1xf32> to vector<32x128xf32>
    %32 = arith.addf %29, %31 : vector<32x128xf32>
    %33 = math.tanh %32 : vector<32x128xf32>
    %c0_28 = arith.constant 0 : index
    %c0_29 = arith.constant 0 : index
    %34 = vector.load %arg12[%c0_28, %c0_29] : memref<32x1xf32, #tpu.memory_space<vmem>>, vector<32x1xf32>
    %35 = vector.broadcast %34 : vector<32x1xf32> to vector<32x128xf32>
    %36 = arith.mulf %35, %33 : vector<32x128xf32>
    %cst_30 = arith.constant dense<0.000000e+00> : vector<128xf32>
    %37 = vector.multi_reduction <add>, %36, %cst_30 [0] : vector<32x128xf32> to vector<128xf32>
    %38 = vector.shape_cast %37 : vector<128xf32> to vector<1x128xf32>
    %c0_31 = arith.constant 0 : index
    %c0_32 = arith.constant 0 : index
    %39 = vector.load %arg13[%c0_31, %c0_32] : memref<1x1xf32, #tpu.memory_space<vmem>>, vector<1x1xf32>
    %40 = vector.broadcast %39 : vector<1x1xf32> to vector<1x128xf32>
    %41 = arith.addf %38, %40 : vector<1x128xf32>
    %c0_33 = arith.constant 0 : index
    %c0_34 = arith.constant 0 : index
    %42 = vector.load %arg14[%c0_33, %c0_34] : memref<1x128xf32, #tpu.memory_space<vmem>>, vector<1x128xf32>
    tpu.vector_store %arg14[%c0_33, %c0_34], %41 {strides = array<i32>} : memref<1x128xf32, #tpu.memory_space<vmem>>, vector<1x128xf32>,
    return
  }
  func.func @transform_0(%arg0: i32) -> (i32, i32) {
    %c0_i32 = arith.constant 0 : i32
    %c0_i32_0 = arith.constant 0 : i32
    return %c0_i32, %arg0 : i32, i32
  }
  func.func @transform_1(%arg0: i32) -> (i32, i32) {
    %c0_i32 = arith.constant 0 : i32
    %c0_i32_0 = arith.constant 0 : i32
    %c0_i32_1 = arith.constant 0 : i32
    return %c0_i32, %c0_i32_0 : i32, i32
  }
  func.func @transform_2(%arg0: i32) -> (i32, i32) {
    %c0_i32 = arith.constant 0 : i32
    %c0_i32_0 = arith.constant 0 : i32
    %c0_i32_1 = arith.constant 0 : i32
    return %c0_i32, %c0_i32_0 : i32, i32
  }
  func.func @transform_3(%arg0: i32) -> (i32, i32) {
    %c0_i32 = arith.constant 0 : i32
    %c0_i32_0 = arith.constant 0 : i32
    %c0_i32_1 = arith.constant 0 : i32
    return %c0_i32, %c0_i32_0 : i32, i32
  }
  func.func @transform_4(%arg0: i32) -> (i32, i32) {
    %c0_i32 = arith.constant 0 : i32
    %c0_i32_0 = arith.constant 0 : i32
    %c0_i32_1 = arith.constant 0 : i32
    return %c0_i32, %c0_i32_0 : i32, i32
  }
  func.func @transform_5(%arg0: i32) -> (i32, i32) {
    %c0_i32 = arith.constant 0 : i32
    %c0_i32_0 = arith.constant 0 : i32
    %c0_i32_1 = arith.constant 0 : i32
    return %c0_i32, %c0_i32_0 : i32, i32
  }
  func.func @transform_6(%arg0: i32) -> (i32, i32) {
    %c0_i32 = arith.constant 0 : i32
    %c0_i32_0 = arith.constant 0 : i32
    %c0_i32_1 = arith.constant 0 : i32
    return %c0_i32, %c0_i32_0 : i32, i32
  }
  func.func @transform_7(%arg0: i32) -> (i32, i32) {
    %c0_i32 = arith.constant 0 : i32
    %c0_i32_0 = arith.constant 0 : i32
    %c0_i32_1 = arith.constant 0 : i32
    return %c0_i32, %c0_i32_0 : i32, i32
  }
  func.func @transform_8(%arg0: i32) -> (i32, i32) {
    %c0_i32 = arith.constant 0 : i32
    %c0_i32_0 = arith.constant 0 : i32
    %c0_i32_1 = arith.constant 0 : i32
    return %c0_i32, %c0_i32_0 : i32, i32
  }
  func.func @transform_9(%arg0: i32) -> (i32, i32) {
    %c0_i32 = arith.constant 0 : i32
    %c0_i32_0 = arith.constant 0 : i32
    %c0_i32_1 = arith.constant 0 : i32
    return %c0_i32, %c0_i32_0 : i32, i32
  }
  func.func @transform_10(%arg0: i32) -> (i32, i32) {
    %c0_i32 = arith.constant 0 : i32
    %c0_i32_0 = arith.constant 0 : i32
    %c0_i32_1 = arith.constant 0 : i32
    return %c0_i32, %c0_i32_0 : i32, i32
  }
  func.func @transform_11(%arg0: i32) -> (i32, i32) {
    %c0_i32 = arith.constant 0 : i32
    %c0_i32_0 = arith.constant 0 : i32
    %c0_i32_1 = arith.constant 0 : i32
    return %c0_i32, %c0_i32_0 : i32, i32
  }
  func.func @transform_12(%arg0: i32) -> (i32, i32) {
    %c0_i32 = arith.constant 0 : i32
    %c0_i32_0 = arith.constant 0 : i32
    %c0_i32_1 = arith.constant 0 : i32
    return %c0_i32, %c0_i32_0 : i32, i32
  }
  func.func @transform_13(%arg0: i32) -> (i32, i32) {
    %c0_i32 = arith.constant 0 : i32
    %c0_i32_0 = arith.constant 0 : i32
    return %c0_i32, %arg0 : i32, i32
  }
}

</mosaic_0001>

<bundles_post_ra>
// kernel: tpu_custom_call.1
= control target key start
LH: loop header
LB: loop body
LE: loop exit
PB: predicated region body
PF: predicated region fallthrough
CT: control target
= control target key end

     0   :  { %s1208_s0 = inlined_call_operand.vmem [shape: f32[16,128], index: 0, kind: input, shape index: {}]   ;;  %s1209_s1 = inlined_call_operand.vmem [shape: f32[32,16], index: 1, kind: input, shape index: {}]   ;;  %s1210_s2 = inlined_call_operand.vmem [shape: f32[32,1], index: 2, kind: input, shape index: {}]   ;;  %s1211_s3 = inlined_call_operand.vmem [shape: f32[32,32], index: 3, kind: input, shape index: {}]   ;;  %s1212_s4 = inlined_call_operand.vmem [shape: f32[32,1], index: 4, kind: input, shape index: {}]   ;;  %s1213_s5 = inlined_call_operand.vmem [shape: f32[32,32], index: 5, kind: input, shape index: {}]   ;;  %s1214_s6 = inlined_call_operand.vmem [shape: f32[32,1], index: 6, kind: input, shape index: {}]   ;;  %s1215_s7 = inlined_call_operand.vmem [shape: f32[32,32], index: 7, kind: input, shape index: {}]   ;;  %s1216_s8 = inlined_call_operand.vmem [shape: f32[32,1], index: 8, kind: input, shape index: {}]   ;;  %s1217_s9 = inlined_call_operand.vmem [shape: f32[32,32], index: 9, kind: input, shape index: {}]   ;;  %s1218_s10 = inlined_call_operand.vmem [shape: f32[32,1], index: 10, kind: input, shape index: {}]   ;;  %s1219_s11 = inlined_call_operand.vmem [shape: f32[32,1], index: 11, kind: input, shape index: {}]   ;;  %s1220_s12 = inlined_call_operand.<no memory space> [shape: f32[1,1], index: 12, kind: input, shape index: {}]   ;;  %s1221_s13 = inlined_call_operand.hbm [shape: f32[1,128], index: 13, kind: output, shape index: {}]  }
   0x1   :  { %v18_v0 = vstv %s1220_s12 }
   0x2   :  { %19 = vst [vmem:[#allocation2] sm:$0x1] %v18_v0 }
   0x3   :  { %v47_v1 = vld [vmem:[%s1208_s0] sm:$0xff]  ;;  %v48_v2 = vld [vmem:[%s1208_s0 + $0x8] sm:$0xff]  ;;  %vm77_vm0 = vcmask 130048   ;;  %v963_v5 = vmov 0   ;;  %v55_v7 = vld [vmem:[%s1210_s2 + $0x10] sm:$0xff] }
   0x4   :  { %v49_v3 = vld [vmem:[%s1209_s1] sm:$0xff]  ;;  %v883_v4 = vpack.c.bf16 %v48_v2, %v47_v1  ;;  %921 = vset.pattern.permute.xlu0 %v963_v5  ;;  %922 = vset.pattern.permute.xlu1 %v963_v5  ;;  %v50_v8 = vld [vmem:[%s1209_s1 + $0x8] sm:$0xff]  ;;  %v51_v10 = vld [vmem:[%s1209_s1 + $0x10] sm:$0xff] }
   0x5   :  { %821 = vmatprep.mubr.msk.f32.mxu0 %vm77_vm0, %v49_v3  ;;  %v53_v6 = vld [vmem:[%s1210_s2] sm:$0xff]  ;;  %v54_v9 = vld [vmem:[%s1210_s2 + $0x8] sm:$0xff]  ;;  %69 = vperm.xlu1 %922, %v55_v7   ;;  %v56_v11 = vld [vmem:[%s1210_s2 + $0x18] sm:$0xff] }
   0x6   :  { %884 = vmatprep.subr.bf16.mxu0 %v883_v4  ;;  %59 = vperm.xlu0 %921, %v53_v6   ;;  %v52_v12 = vld [vmem:[%s1209_s1 + $0x18] sm:$0xff]  ;;  %v183_v13 = vld [vmem:[%s1212_s4] sm:$0xff]  ;;  %v184_v14 = vld [vmem:[%s1212_s4 + $0x8] sm:$0xff] }
   0x7   :  { %886 = vmatpush3.bf16.msra.mxu0 %v883_v4 }
   0x9   :  { %74 = vperm.xlu1 %922, %v56_v11  }
   0xa   :  { %822 = vmatmul.mubr.msk.f32.vlgmr.msra.gmra.mrb[0].mxu0 %vm77_vm0, %v50_v8  ;;  %64 = vperm.xlu0 %921, %v54_v9  }
   0xb   :  { %824 = vmatprep.mubr.msk.f32.mxu0 %vm77_vm0, %v51_v10 }
   0xc   :  { %20 = vsyncpa [#allocation4], 0  ;;  %v185_v15 = vld [vmem:[%s1212_s4 + $0x10] sm:$0xff]  ;;  %v186_v16 = vld [vmem:[%s1212_s4 + $0x18] sm:$0xff]  ;;  %vm207_vm1 = vcmask 261120  }
   0xd   :  { %194 = vperm.xlu1 %922, %v184_v14   ;;  %v313_v17 = vld [vmem:[%s1214_s6] sm:$0xff]  ;;  %v314_v18 = vld [vmem:[%s1214_s6 + $0x8] sm:$0xff]  ;;  %v315_v19 = vld [vmem:[%s1214_s6 + $0x10] sm:$0xff] }
   0xe   :  { %825 = vmatmul.mubr.msk.f32.gmra.mrb[2].mxu0 %vm77_vm0, %v52_v12  ;;  %189 = vperm.xlu0 %921, %v183_v13   ;;  %v316_v20 = vld [vmem:[%s1214_s6 + $0x18] sm:$0xff]  ;;  %v442_v21 = vld [vmem:[%s1216_s8] sm:$0xff]  ;;  %v443_v22 = vld [vmem:[%s1216_s8 + $0x8] sm:$0xff] }
   0xf   :  { %v444_v23 = vld [vmem:[%s1216_s8 + $0x10] sm:$0xff]  ;;  %v445_v24 = vld [vmem:[%s1216_s8 + $0x18] sm:$0xff]  ;;  %v571_v25 = vld [vmem:[%s1218_s10] sm:$0xff] }
  0x10   :  { %v572_v26 = vld [vmem:[%s1218_s10 + $0x8] sm:$0xff]  ;;  %v573_v27 = vld [vmem:[%s1218_s10 + $0x10] sm:$0xff]  ;;  %v574_v28 = vld [vmem:[%s1218_s10 + $0x18] sm:$0xff] }
  0x11   :  { %204 = vperm.xlu1 %922, %v186_v16   ;;  %v696_v29 = vld [vmem:[%s1219_s11] sm:$0xff]  ;;  %v697_v30 = vld [vmem:[%s1219_s11 + $0x8] sm:$0xff]  ;;  %v698_v31 = vld [vmem:[%s1219_s11 + $0x10] sm:$0xff] }
  0x12   :  { %199 = vperm.xlu0 %921, %v185_v15   ;;  %v699_v32 = vld [vmem:[%s1219_s11 + $0x18] sm:$0xff]  ;;  %v733_v33 = vld [vmem:[#allocation2] sm:$0x1]  ;;  %v180_v53 = vld [vmem:[%s1211_s3 + $0x8] sm:$0xff] }
  0x13   :  { %v179_v34 = vld [vmem:[%s1211_s3] sm:$0xff]  ;;  %v181_v54 = vld [vmem:[%s1211_s3 + $0x10] sm:$0xff]  ;;  %v182_v55 = vld [vmem:[%s1211_s3 + $0x18] sm:$0xff] }
  0x14   :  { %835 = vmatprep.mubr.msk.f32.mxu1 %vm207_vm1, %v179_v34  ;;  %v309_v56 = vld [vmem:[%s1213_s5] sm:$0xff]  ;;  %v310_v11 = vld [vmem:[%s1213_s5 + $0x8] sm:$0xff]  ;;  %v311_v12 = vld [vmem:[%s1213_s5 + $0x10] sm:$0xff] }
  0x15   :  { %324 = vperm.xlu1 %922, %v314_v18   ;;  %849 = vmatprep.mubr.msk.f32.mxu0 %vm207_vm1, %v309_v56  ;;  %v312_v13 = vld [vmem:[%s1213_s5 + $0x18] sm:$0xff]  ;;  %v438_v14 = vld [vmem:[%s1215_s7] sm:$0xff]  ;;  %v440_v34 = vld [vmem:[%s1215_s7 + $0x10] sm:$0xff] }
  0x16   :  { %319 = vperm.xlu0 %921, %v313_v17   ;;  %v569_v56 = vld [vmem:[%s1217_s9 + $0x10] sm:$0xff] }
  0x19   :  { %334 = vperm.xlu1 %922, %v316_v20  }
  0x1a   :  { %329 = vperm.xlu0 %921, %v315_v19  }
  0x1d   :  { %453 = vperm.xlu1 %922, %v443_v22  }
  0x1e   :  { %448 = vperm.xlu0 %921, %v442_v21  }
  0x21   :  { %463 = vperm.xlu1 %922, %v445_v24  }
  0x22   :  { %458 = vperm.xlu0 %921, %v444_v23  }
  0x25   :  { %582 = vperm.xlu1 %922, %v572_v26  }
  0x26   :  { %577 = vperm.xlu0 %921, %v571_v25  }
  0x29   :  { %592 = vperm.xlu1 %922, %v574_v28  }
  0x2a   :  { %587 = vperm.xlu0 %921, %v573_v27  }
  0x2d   :  { %707 = vperm.xlu1 %922, %v697_v30  }
  0x2e   :  { %702 = vperm.xlu0 %921, %v696_v29  }
  0x31   :  { %717 = vperm.xlu1 %922, %v699_v32  }
  0x32   :  { %712 = vperm.xlu0 %921, %v698_v31  }
  0x36   :  { %736 = vperm.xlu0 %921, %v733_v33   ;;  %v439_v33 = vld [vmem:[%s1215_s7 + $0x8] sm:$0xff] }
  0x84   :  { %v70_v36 = vpop.permute.xlu1 %69 }
  0x85   :  { %v60_v35 = vpop.permute.xlu0 %59 }
  0x88   :  { %v75_v42 = vpop.permute.xlu1 %74 }
  0x89   :  { %v65_v37 = vpop.permute.xlu0 %64 }
  0x8c   :  { %v195_v57 = vpop.permute.xlu1 %194 }
  0x8d   :  { %v190_v58 = vpop.permute.xlu0 %189 }
  0x90   :  { %v205_v0 = vpop.permute.xlu1 %204 }
  0x91   :  { %v200_v3 = vpop.permute.xlu0 %199 }
  0x94   :  { %v325_v15 = vpop.permute.xlu1 %324 }
  0x95   :  { %v320_v16 = vpop.permute.xlu0 %319 }
  0x98   :  { %v335_v22 = vpop.permute.xlu1 %334 }
  0x99   :  { %v330_v25 = vpop.permute.xlu0 %329 }
  0xdd   :  { %v823_v38 = vpop.f32.mrb[0].mxu0 }
  0xde   :  { %v162_v39 = vadd.f32 %v823_v38, %v65_v37  ;;  %v156_v40 = vpop.f32.mrb[1].mxu0  ;;  %v454_v37 = vpop.permute.xlu1 %453 }
  0xdf   :  { %v157_v41 = vadd.f32 %v156_v40, %v60_v35  ;;  %v441_v35 = vld [vmem:[%s1215_s7 + $0x18] sm:$0xff]  ;;  %v449_v38 = vpop.permute.xlu0 %448 }
  0xe0   :  { %923 = vtanh.f32 %v162_v39 }
  0xe1   :  { %925 = vtanh.f32 %v157_v41  ;;  %v826_v43 = vpop.f32.mrb[2].mxu0 }
  0xe2   :  { %v172_v44 = vadd.f32 %v826_v43, %v75_v42  ;;  %v166_v45 = vpop.f32.mrb[3].mxu0 }
  0xe3   :  { %v167_v46 = vadd.f32 %v166_v45, %v70_v36  ;;  %v567_v36 = vld [vmem:[%s1217_s9] sm:$0xff] }
  0xe4   :  { %927 = vtanh.f32 %v172_v44  ;;  %v464_v44 = vpop.permute.xlu1 %463 }
  0xe5   :  { %929 = vtanh.f32 %v167_v46 }
  0xea   :  { %v924_v47 = vpop.eup %923 }
  0xeb   :  { %v926_v48 = vpop.eup %925 }
  0xec   :  { %v887_v49 = vpack.c.bf16 %v924_v47, %v926_v48  ;;  %v459_v47 = vpop.permute.xlu0 %458 }
  0xee   :  { %v928_v50 = vpop.eup %927  ;;  %888 = vmatprep.subr.bf16.mxu1 %v887_v49 }
  0xef   :  { %v930_v51 = vpop.eup %929  ;;  %890 = vmatpush3.bf16.msra.mxu1 %v887_v49 }
  0xf0   :  { %v891_v52 = vpack.c.bf16 %v928_v50, %v930_v51 }
  0xf2   :  { %892 = vmatprep.subr.bf16.mxu1 %v891_v52 }
  0xf3   :  { %894 = vmatpush3.bf16.msra.mxu1 %v891_v52 }
  0xf6   :  { %836 = vmatmul.mubr.msk.f32.vlgmr.msra.gmra.mrb[0].mxu1 %vm207_vm1, %v180_v53 }
  0xf7   :  { %838 = vmatprep.mubr.msk.f32.mxu1 %vm207_vm1, %v181_v54 }
  0xfa   :  { %839 = vmatmul.mubr.msk.f32.gmra.mrb[2].mxu1 %vm207_vm1, %v182_v55  ;;  %v568_v55 = vld [vmem:[%s1217_s9 + $0x8] sm:$0xff] }
  0xfb   :  { %863 = vmatprep.mubr.msk.f32.mxu1 %vm207_vm1, %v438_v14 }
 0x1c9   :  { %v837_v59 = vpop.f32.mrb[0].mxu1 }
 0x1ca   :  { %v292_v60 = vadd.f32 %v837_v59, %v195_v57  ;;  %v286_v61 = vpop.f32.mrb[1].mxu1  ;;  %v570_v57 = vld [vmem:[%s1217_s9 + $0x18] sm:$0xff]  ;;  %v578_v59 = vpop.permute.xlu0 %577  ;;  %s964_s9 = smov [#allocation3]  }
 0x1cb   :  { %v287_v62 = vadd.f32 %v286_v61, %v190_v58  ;;  %v583_v58 = vpop.permute.xlu1 %582  ;;  %s751_s23 = sshll.u32 %s964_s9, 4  ;;  %s752_s23 = int_to_ptr.vmem [resolvable:$true] %s751_s23 }
 0x1cc   :  { %v306_v63 = vmax.f32 %v292_v60, 0.0  ;;  %s939_s24 = scalar_lea.vmem %s752_s23, 16  ;;  %s943_s25 = scalar_lea.vmem %s752_s23, 32 }
 0x1cd   :  { %v305_v1 = vmax.f32 %v287_v62, 0.0  ;;  %v840_v2 = vpop.f32.mrb[2].mxu1  ;;  %p940_p0 = scmp.ne.s32.totalorder %s752_s23, %s939_s24  ;;  %p944_p1 = scmp.lt.s32.totalorder %s752_s23, %s752_s23 }
 0x1ce   :  { %v302_v4 = vadd.f32 %v840_v2, %v205_v0  ;;  %v296_v5 = vpop.f32.mrb[3].mxu1  ;;  %v588_v2 = vpop.permute.xlu0 %587  ;;  %p945_p2 = scmp.lt.s32.totalorder %s943_s25, %s939_s24 }
 0x1cf   :  { %v895_v6 = vpack.c.bf16 %v306_v63, %v305_v1  ;;  %v297_v7 = vadd.f32 %v296_v5, %v200_v3  ;;  %v593_v0 = vpop.permute.xlu1 %592 }
 0x1d0   :  { %v308_v8 = vmax.f32 %v302_v4, 0.0  ;;  %p946_p3 = por %p945_p2, %p944_p1 }
 0x1d1   :  { %v307_v9 = vmax.f32 %v297_v7, 0.0  ;;  %896 = vmatprep.subr.bf16.mxu0 %v895_v6 }
 0x1d2   :  { %898 = vmatpush3.bf16.msra.mxu0 %v895_v6  ;;  %v703_v6 = vpop.permute.xlu0 %702  ;;  %p947_p4 = pnand %p946_p3, %p940_p0 }
 0x1d3   :  { %v899_v10 = vpack.c.bf16 %v308_v8, %v307_v9  ;;  %v708_v8 = vpop.permute.xlu1 %707 }
 0x1d5   :  { %900 = vmatprep.subr.bf16.mxu0 %v899_v10 }
 0x1d6   :  { %902 = vmatpush3.bf16.msra.mxu0 %v899_v10 }
 0x1d9   :  { %850 = vmatmul.mubr.msk.f32.vlgmr.msra.gmra.mrb[4].mxu0 %vm207_vm1, %v310_v11 }
 0x1da   :  { %852 = vmatprep.mubr.msk.f32.mxu0 %vm207_vm1, %v311_v12 }
 0x1dd   :  { %853 = vmatmul.mubr.msk.f32.gmra.mrb[6].mxu0 %vm207_vm1, %v312_v13 }
 0x1de   :  { %877 = vmatprep.mubr.msk.f32.mxu0 %vm207_vm1, %v567_v36 }
 0x2ac   :  { %v851_v17 = vpop.f32.mrb[4].mxu0 }
 0x2ad   :  { %v421_v18 = vadd.f32 %v851_v17, %v325_v15  ;;  %v415_v19 = vpop.f32.mrb[5].mxu0  ;;  %v713_v15 = vpop.permute.xlu0 %712 }
 0x2ae   :  { %v416_v20 = vadd.f32 %v415_v19, %v320_v16  ;;  %v718_v17 = vpop.permute.xlu1 %717 }
 0x2af   :  { %v435_v21 = vmax.f32 %v421_v18, 0.0 }
 0x2b0   :  { %v434_v23 = vmax.f32 %v416_v20, 0.0  ;;  %v854_v24 = vpop.f32.mrb[6].mxu0  ;;  %v739_v20 = vlaneseq }
 0x2b1   :  { %v431_v26 = vadd.f32 %v854_v24, %v335_v22  ;;  %v425_v27 = vpop.f32.mrb[7].mxu0 }
 0x2b2   :  { %v903_v28 = vpack.c.bf16 %v435_v21, %v434_v23  ;;  %v426_v29 = vadd.f32 %v425_v27, %v330_v25  ;;  %v740_v23 = vshrl.u32 %v739_v20, 7 }
 0x2b3   :  { %v437_v30 = vmax.f32 %v431_v26, 0.0 }
 0x2b4   :  { %v436_v31 = vmax.f32 %v426_v29, 0.0  ;;  %904 = vmatprep.subr.bf16.mxu1 %v903_v28  ;;  %v741_v26 = vsub.s32 0, %v740_v23 }
 0x2b5   :  { %906 = vmatpush3.bf16.msra.mxu1 %v903_v28  ;;  %v737_v28 = vpop.permute.xlu0 %736 }
 0x2b6   :  { %v907_v32 = vpack.c.bf16 %v437_v30, %v436_v31  ;;  %v742_v30 = vrot.slane %v737_v28, %v741_v26 }
 0x2b8   :  { %908 = vmatprep.subr.bf16.mxu1 %v907_v32 }
 0x2b9   :  { %910 = vmatpush3.bf16.msra.mxu1 %v907_v32 }
 0x2bc   :  { %864 = vmatmul.mubr.msk.f32.vlgmr.msra.gmra.mrb[4].mxu1 %vm207_vm1, %v439_v33 }
 0x2bd   :  { %866 = vmatprep.mubr.msk.f32.mxu1 %vm207_vm1, %v440_v34 }
 0x2c0   :  { %867 = vmatmul.mubr.msk.f32.gmra.mrb[6].mxu1 %vm207_vm1, %v441_v35 }
 0x38f   :  { %v865_v39 = vpop.f32.mrb[4].mxu1 }
 0x390   :  { %v550_v40 = vadd.f32 %v865_v39, %v454_v37  ;;  %v544_v41 = vpop.f32.mrb[5].mxu1 }
 0x391   :  { %v545_v42 = vadd.f32 %v544_v41, %v449_v38 }
 0x392   :  { %v564_v43 = vmax.f32 %v550_v40, 0.0 }
 0x393   :  { %v563_v45 = vmax.f32 %v545_v42, 0.0  ;;  %v868_v46 = vpop.f32.mrb[6].mxu1 }
 0x394   :  { %v560_v48 = vadd.f32 %v868_v46, %v464_v44  ;;  %v554_v49 = vpop.f32.mrb[7].mxu1 }
 0x395   :  { %v911_v50 = vpack.c.bf16 %v564_v43, %v563_v45  ;;  %v555_v51 = vadd.f32 %v554_v49, %v459_v47 }
 0x396   :  { %v566_v52 = vmax.f32 %v560_v48, 0.0 }
 0x397   :  { %v565_v53 = vmax.f32 %v555_v51, 0.0  ;;  %912 = vmatprep.subr.bf16.mxu0 %v911_v50 }
 0x398   :  { %914 = vmatpush3.bf16.msra.mxu0 %v911_v50 }
 0x399   :  { %v915_v54 = vpack.c.bf16 %v566_v52, %v565_v53 }
 0x39b   :  { %916 = vmatprep.subr.bf16.mxu0 %v915_v54 }
 0x39c   :  { %918 = vmatpush3.bf16.msra.mxu0 %v915_v54 }
 0x39f   :  { %878 = vmatmul.mubr.msk.f32.vlgmr.msra.gmra.mrb[8].mxu0 %vm207_vm1, %v568_v55 }
 0x3a0   :  { %880 = vmatprep.mubr.msk.f32.mxu0 %vm207_vm1, %v569_v56 }
 0x3a3   :  { %881 = vmatmul.mubr.msk.f32.gmra.mrb[10].mxu0 %vm207_vm1, %v570_v57 }
 0x472   :  { %v879_v60 = vpop.f32.mrb[8].mxu0 }
 0x473   :  { %v679_v61 = vadd.f32 %v879_v60, %v583_v58  ;;  %v673_v62 = vpop.f32.mrb[9].mxu0 }
 0x474   :  { %v674_v63 = vadd.f32 %v673_v62, %v578_v59 }
 0x475   :  { %931 = vtanh.f32 %v679_v61 }
 0x476   :  { %933 = vtanh.f32 %v674_v63  ;;  %v882_v1 = vpop.f32.mrb[10].mxu0 }
 0x477   :  { %v689_v3 = vadd.f32 %v882_v1, %v593_v0  ;;  %v683_v4 = vpop.f32.mrb[11].mxu0 }
 0x478   :  { %v684_v5 = vadd.f32 %v683_v4, %v588_v2 }
 0x479   :  { %935 = vtanh.f32 %v689_v3 }
 0x47a   :  { %937 = vtanh.f32 %v684_v5 }
 0x47f   :  { %v932_v7 = vpop.eup %931 }
 0x480   :  { %v934_v9 = vpop.eup %933  ;;  %v721_v10 = vmul.f32 %v932_v7, %v708_v8 }
 0x481   :  { %v720_v11 = vmul.f32 %v934_v9, %v703_v6 }
 0x483   :  { %v936_v12 = vpop.eup %935  ;;  %v724_v13 = vadd.f32 %v721_v10, %v720_v11 }
 0x484   :  { %v938_v14 = vpop.eup %937  ;;  %v723_v18 = vmul.f32 %v936_v12, %v718_v17 }
 0x485   :  { %v722_v16 = vmul.f32 %v938_v14, %v713_v15 }
 0x487   :  { %v725_v19 = vadd.f32 %v724_v13, %v722_v16 }
 0x489   :  { %v726_v21 = vadd.f32 %v725_v19, %v723_v18 }
 0x48b   :  { %v727_v22 = vrot.slane %v726_v21, 4 }
 0x48d   :  { %v728_v24 = vadd.f32 %v727_v22, %v726_v21 }
 0x48f   :  { %v729_v25 = vrot.slane %v728_v24, 2 }
 0x491   :  { %v730_v27 = vadd.f32 %v729_v25, %v728_v24 }
 0x493   :  { %v731_v29 = vrot.slane %v730_v27, 1 }
 0x495   :  { %v732_v31 = vadd.f32 %v731_v29, %v730_v27 }
 0x497   :  { %v743_v32 = vadd.f32 %v742_v30, %v732_v31 }
 0x499   :  { %744 = vst [vmem:[#allocation3] sm:$0x1] %v743_v32 }
 0x49a   :  { %950 = shalt.err (!%p947_p4)
}
 0x49b   :  { %s951_s28 = scalar_lea.hbm %s1221_s13, 16 }
 0x49c   :  { %p952_p5 = scmp.ne.s32.totalorder %s1221_s13, %s951_s28  ;;  %p955_p6 = scmp.lt.u32.totalorder %s951_s28, %s1221_s13 }
 0x49e   :  { %p957_p7 = pnand %p955_p6, %p952_p5 }
 0x4a0   :  { %960 = shalt.err (!%p957_p7)
}
 0x4a1   :  { %754 = dma.vmem_to_hbm [thread:$0]  %s752_s23, 16, %s1221_s13, [#allocation4]  }
 0x4a2   :  { %961 = dma.done.wait [#allocation4], 16  }
 0x4a3   :  { %962 = vsyncadd [#allocation4], 4294967280 }
 0x4a4   :  { %758 = vsyncpa [#allocation4], 1 }

</bundles_post_ra>
